<compile_context>
chip_gen: v7x
topology: tpu7x:2x2x1
jax: 0.10.0
libtpu: 0.0.40
codegen_flags: <defaults>
</compile_context>

<pallas_src>
import jax
import jax.numpy as jnp
from jax import lax
from jax.experimental import pallas as pl
from jax.experimental.pallas import tpu as pltpu


def _round_up(x, m):
    return (x + m - 1) // m * m


def _default_x_tile_bytes():
    """Per-generation X-tile budget (per double-buffered input buffer)."""
    try:
        kind = jax.devices()[0].device_kind.lower()
    except Exception:
        return 4 << 20
    if ("v6" in kind) or ("v7" in kind):
        return 10 << 20          # 32 MiB scoped-VMEM default: 2x10 MiB X + resident weight fits
    return 4 << 20               # v5e (16 MiB scoped default) and anything unknown: stay safe


def _cnnx_head_kernel(x_ref, w_ref, b_ref, o_ref):
    """Fused avgpool + fc as a K-tiled streaming matmul.

    x_ref : (TB, TK)  flattened NCHW features (batch tile i, K tile k)
    w_ref : (2, Kp)   pool-folded fc weight, fully VMEM-resident (constant index_map)
    b_ref : (1, 2)    fc bias (f32)
    o_ref : (TB, 2)   f32 logits; block index constant across the K axis -> accumulator
    """
    k = pl.program_id(1)
    tk = x_ref.shape[1]

    @pl.when(k == 0)
    def _():
        o_ref[...] = jnp.zeros_like(o_ref)

    # Slice the resident weight for this K tile (128-aligned offset, no weight DMA per step).
    off = pl.multiple_of(k * tk, 128)
    w_tile = w_ref[:, pl.ds(off, tk)]

    # (TB, TK) . (2, TK) contracting the lane-dense K axis -> (TB, 2), f32 accumulation.
    o_ref[...] += lax.dot_general(
        x_ref[...], w_tile,
        dimension_numbers=(((1,), (1,)), ((), ())),
        preferred_element_type=jnp.float32)

    @pl.when(k == pl.num_programs(1) - 1)
    def _():
        # Dropout(0.25) is identity in eval mode; no masking applied.
        o_ref[...] += b_ref[...]


def fold_cnnx_fc(fc_weight, fc_bias, H, W, dtype=jnp.float32):
    """One-off per weight set: fold the 1/HW pooling into the fc weight, expanded to the
    (c*HW + s) flattening order of an NCHW feature map.  Hoist this out of the per-call
    path -- rebuilding it every call would add ~2*K HBM write+read per forward."""
    HW = H * W
    w_exp = (jnp.repeat(fc_weight, HW, axis=1) * (1.0 / HW)).astype(dtype)   # (2, C*HW)
    bias = fc_bias.reshape(1, -1).astype(jnp.float32)                        # (1, 2)
    return w_exp, bias


def cnnx_head_folded(feat_nchw, w_exp, bias, *, tb_cap=64, x_tile_bytes=None):
    """Pallas forward of CNNX's avgpool -> flatten -> fc -> dropout(eval), given the
    pre-folded weight (see fold_cnnx_fc).

    feat_nchw : (B, C, H, W) f32 or bf16 backbone features (bf16 halves HBM traffic)
    w_exp     : (2, C*H*W)   pool-folded fc weight
    bias      : (1, 2) f32   fc bias
    returns   : (B, 2) f32 logits
    """
    B, C, H, W = feat_nchw.shape
    K = C * H * W
    assert w_exp.shape == (2, K), (w_exp.shape, K)

    # Free reshape (NCHW is contiguous): no transpose, no extra HBM pass.
    x = feat_nchw.reshape(B, K)
    w_exp = w_exp.astype(x.dtype)        # match streamed feature dtype (f32 acc in-kernel)

    elt = x.dtype.itemsize
    if x_tile_bytes is None:
        x_tile_bytes = _default_x_tile_bytes()

    # ---- K padding: zero columns contribute nothing; guarantees tk | Kp exactly ----
    Kp = _round_up(K, 128)
    if Kp != K:
        x = jnp.pad(x, ((0, 0), (0, Kp - K)))
        w_exp = jnp.pad(w_exp, ((0, 0), (0, Kp - K)))

    # ---- batch tiling: TB rows per grid step (parallel axis) ----
    align = 16 if elt == 2 else 8        # bf16 packs 16 sublanes per vreg
    if B <= align:
        tb = B                           # tiny batch: single full-extent tile
    else:
        # at least two batch tiles so "parallel" can shard across TCs (v7x megacore)
        tb = min(tb_cap, max(align, _round_up(-(-B // 2), align)))
    bp = _round_up(B, tb)
    if bp != B:
        x = jnp.pad(x, ((0, bp - B), (0, 0)))

    # ---- K tiling: largest 128-multiple divisor of Kp within the per-buffer budget ----
    if tb * Kp * elt <= x_tile_bytes:
        tk = Kp
    else:
        cands = [d for d in range(128, Kp + 1, 128)
                 if Kp % d == 0 and tb * d * elt <= x_tile_bytes]
        tk = max(cands) if cands else 128
    assert Kp % tk == 0 and tk % 128 == 0, (Kp, tk)

    out = pl.pallas_call(
        _cnnx_head_kernel,
        out_shape=jax.ShapeDtypeStruct((bp, 2), jnp.float32),
        grid_spec=pltpu.PrefetchScalarGridSpec(
            num_scalar_prefetch=0,
            grid=(bp // tb, Kp // tk),
            in_specs=[
                pl.BlockSpec((tb, tk), lambda i, k: (i, k)),   # streamed features
                pl.BlockSpec((2, Kp), lambda i, k: (0, 0)),    # weight: VMEM-resident, no re-DMA
                pl.BlockSpec((1, 2), lambda i, k: (0, 0)),     # bias
            ],
            out_specs=pl.BlockSpec((tb, 2), lambda i, k: (i, 0)),
        ),
        compiler_params=pltpu.CompilerParams(
            dimension_semantics=("parallel", "arbitrary"),
        ),
    )(x, w_exp, bias)

    return out[:B]


def cnnx_head(feat_nchw, fc_weight, fc_bias, **kwargs):
    """Convenience path (folds the weight per call; prefer fold_cnnx_fc + cnnx_head_folded)."""
    _, _, H, W = feat_nchw.shape
    w_exp, bias = fold_cnnx_fc(fc_weight, fc_bias, H, W, dtype=feat_nchw.dtype)
    return cnnx_head_folded(feat_nchw, w_exp, bias, **kwargs)


def _reference(feat_nchw, fc_weight, fc_bias):
    """Pure-JAX reference mirroring the PyTorch forward (eval mode)."""
    pooled = jnp.mean(feat_nchw.astype(jnp.float32), axis=(2, 3))   # (B, C)
    return pooled @ fc_weight.T + fc_bias                            # (B, 2)


if __name__ == "__main__":
    # Small shapes consistent with the module: fc expects exactly 2048 input features,
    # so C = 2048; keep batch and spatial small.
    B, C, H, W = 2, 2048, 2, 2

    key = jax.random.PRNGKey(0)
    k_feat, k_w, k_b = jax.random.split(key, 3)

    # Deterministic synthetic backbone features (stand-in for the undefined resnet()).
    feat = jax.random.normal(k_feat, (B, C, H, W), dtype=jnp.float32)

    # Deterministic Linear(2048, 2) init (PyTorch-style uniform(-1/sqrt(in), 1/sqrt(in))).
    bound = 1.0 / jnp.sqrt(jnp.float32(C))
    fc_weight = jax.random.uniform(k_w, (2, C), jnp.float32, -bound, bound)
    fc_bias = jax.random.uniform(k_b, (2,), jnp.float32, -bound, bound)

    ref = _reference(feat, fc_weight, fc_bias)

    # Fold the fc weight ONCE per weight set (hoisted out of the per-call path).
    w_exp, bias = fold_cnnx_fc(fc_weight, fc_bias, H, W)

    # f32 feature path.
    out = cnnx_head_folded(feat, w_exp, bias)
    out = jax.block_until_ready(out)
    assert out.shape == (B, 2)
    assert jnp.allclose(out, ref, atol=1e-3, rtol=1e-3), (out, ref)

    # bf16 feature path (halves streamed HBM bytes; accumulation stays f32 in-kernel).
    out_bf16 = cnnx_head_folded(feat.astype(jnp.bfloat16), w_exp, bias)
    out_bf16 = jax.block_until_ready(out_bf16)
    assert jnp.allclose(out_bf16, ref, atol=5e-2, rtol=5e-2), (out_bf16, ref)

    print("KERNEL_OK")
</pallas_src>

<mosaic_0001>
module attributes {stable_mosaic.version = 11 : i64} {
  func.func @_cnnx_head_kernel(%arg0: i32, %arg1: i32, %arg2: memref<2x8192xf32, #tpu.memory_space<vmem>>, %arg3: memref<2x8192xf32, #tpu.memory_space<vmem>>, %arg4: memref<1x2xf32, #tpu.memory_space<vmem>>, %arg5: memref<2x2xf32, #tpu.memory_space<vmem>>) attributes {dimension_semantics = [#tpu.dimension_semantics<parallel>, #tpu.dimension_semantics<arbitrary>], iteration_bounds = array<i64: 1, 1>, scalar_prefetch = 0 : i64, scratch_operands = 0 : i64, tpu.core_type = #tpu.core_type<tc>, window_params = [{transform_indices = @transform_0, window_bounds = array<i64: 2, 8192>}, {pipeline_mode = #tpu.pipeline_mode<synchronous>, transform_indices = @transform_1, window_bounds = array<i64: 2, 8192>}, {pipeline_mode = #tpu.pipeline_mode<synchronous>, transform_indices = @transform_2, window_bounds = array<i64: 1, 2>}, {transform_indices = @transform_3, window_bounds = array<i64: 2, 2>}]} {
    %c0_i32 = arith.constant 0 : i32
    %0 = arith.cmpi eq, %arg1, %c0_i32 : i32
    %1 = arith.extui %0 : i1 to i32
    %c0_i32_0 = arith.constant 0 : i32
    %2 = arith.cmpi ne, %1, %c0_i32_0 : i32
    scf.if %2 {
      %cst_9 = arith.constant 0.000000e+00 : f32
      %15 = vector.broadcast %cst_9 : f32 to vector<2x2xf32>
      %c0_10 = arith.constant 0 : index
      %c0_11 = arith.constant 0 : index
      %16 = vector.load %arg5[%c0_10, %c0_11] : memref<2x2xf32, #tpu.memory_space<vmem>>, vector<2x2xf32>
      tpu.vector_store %arg5[%c0_10, %c0_11], %15 {strides = array<i32>} : memref<2x2xf32, #tpu.memory_space<vmem>>, vector<2x2xf32>,
    } else {
    }
    %c8192_i32 = arith.constant 8192 : i32
    %3 = arith.muli %arg1, %c8192_i32 : i32
    %4 = tpu.assume_multiple %3, 128 : i32
    %c0 = arith.constant 0 : index
    %5 = arith.index_cast %4 : i32 to index
    %6 = vector.load %arg3[%c0, %5] : memref<2x8192xf32, #tpu.memory_space<vmem>>, vector<2x8192xf32>
    %c0_1 = arith.constant 0 : index
    %c0_2 = arith.constant 0 : index
    %7 = vector.load %arg5[%c0_1, %c0_2] : memref<2x2xf32, #tpu.memory_space<vmem>>, vector<2x2xf32>
    %c0_3 = arith.constant 0 : index
    %c0_4 = arith.constant 0 : index
    %8 = vector.load %arg2[%c0_3, %c0_4] : memref<2x8192xf32, #tpu.memory_space<vmem>>, vector<2x8192xf32>
    %cst = arith.constant dense<0.000000e+00> : vector<2x2xf32>
    %9 = tpu.matmul %8, %6, %cst {dimension_numbers = #tpu.dot_dimension_numbers<[1], [1], [0], [0], [0, 0, 1, 0], [], []>} : vector<2x8192xf32>, vector<2x8192xf32>, vector<2x2xf32> -> vector<2x2xf32>
    %10 = arith.addf %7, %9 : vector<2x2xf32>
    %c0_5 = arith.constant 0 : index
    %c0_6 = arith.constant 0 : index
    %11 = vector.load %arg5[%c0_5, %c0_6] : memref<2x2xf32, #tpu.memory_space<vmem>>, vector<2x2xf32>
    tpu.vector_store %arg5[%c0_5, %c0_6], %10 {strides = array<i32>} : memref<2x2xf32, #tpu.memory_space<vmem>>, vector<2x2xf32>,
    %c0_i32_7 = arith.constant 0 : i32
    %12 = arith.cmpi eq, %arg1, %c0_i32_7 : i32
    %13 = arith.extui %12 : i1 to i32
    %c0_i32_8 = arith.constant 0 : i32
    %14 = arith.cmpi ne, %13, %c0_i32_8 : i32
    scf.if %14 {
      %c0_9 = arith.constant 0 : index
      %c0_10 = arith.constant 0 : index
      %15 = vector.load %arg5[%c0_9, %c0_10] : memref<2x2xf32, #tpu.memory_space<vmem>>, vector<2x2xf32>
      %c0_11 = arith.constant 0 : index
      %c0_12 = arith.constant 0 : index
      %16 = vector.load %arg4[%c0_11, %c0_12] : memref<1x2xf32, #tpu.memory_space<vmem>>, vector<1x2xf32>
      %17 = vector.broadcast %16 : vector<1x2xf32> to vector<2x2xf32>
      %18 = arith.addf %15, %17 : vector<2x2xf32>
      %c0_13 = arith.constant 0 : index
      %c0_14 = arith.constant 0 : index
      %19 = vector.load %arg5[%c0_13, %c0_14] : memref<2x2xf32, #tpu.memory_space<vmem>>, vector<2x2xf32>
      tpu.vector_store %arg5[%c0_13, %c0_14], %18 {strides = array<i32>} : memref<2x2xf32, #tpu.memory_space<vmem>>, vector<2x2xf32>,
    } else {
    }
    return
  }
  func.func @transform_0(%arg0: i32, %arg1: i32) -> (i32, i32) {
    %c0_i32 = arith.constant 0 : i32
    return %arg0, %arg1 : i32, i32
  }
  func.func @transform_1(%arg0: i32, %arg1: i32) -> (i32, i32) {
    %c0_i32 = arith.constant 0 : i32
    %c0_i32_0 = arith.constant 0 : i32
    %c0_i32_1 = arith.constant 0 : i32
    return %c0_i32, %c0_i32_0 : i32, i32
  }
  func.func @transform_2(%arg0: i32, %arg1: i32) -> (i32, i32) {
    %c0_i32 = arith.constant 0 : i32
    %c0_i32_0 = arith.constant 0 : i32
    %c0_i32_1 = arith.constant 0 : i32
    return %c0_i32, %c0_i32_0 : i32, i32
  }
  func.func @transform_3(%arg0: i32, %arg1: i32) -> (i32, i32) {
    %c0_i32 = arith.constant 0 : i32
    %c0_i32_0 = arith.constant 0 : i32
    return %arg0, %c0_i32 : i32, i32
  }
}

</mosaic_0001>

<bundles_post_ra>
// kernel: tpu_custom_call.1
= control target key start
LH: loop header
LB: loop body
LE: loop exit
PB: predicated region body
PF: predicated region fallthrough
CT: control target
= control target key end

     0   :  { %8 = vsyncpa [#allocation3], 0  ;;  %s3304_s0 = inlined_call_operand.hbm [shape: f32[2,8192], index: 0, kind: input, shape index: {}]   ;;  %s3305_s1 = inlined_call_operand.hbm [shape: f32[2,8192], index: 1, kind: input, shape index: {}]   ;;  %s3306_s2 = inlined_call_operand.vmem [shape: f32[1,2], index: 2, kind: input, shape index: {}]   ;;  %s3307_s3 = inlined_call_operand.hbm [shape: f32[2,2], index: 3, kind: output, shape index: {}]  }
   0x1   :  { %9 = vsyncpa [#allocation6], 0 }
   0x2   :  { %10 = vsyncpa [#allocation4], 0  ;;  %s3171_s12 = smov [#allocation2]   ;;  %s3172_s14 = smov [#allocation5]  }
   0x3   :  { %s17_s13 = sshll.u32 %s3171_s12, 4  ;;  %s27_s15 = sshll.u32 %s3172_s14, 4  ;;  %s18_s13 = int_to_ptr.vmem [resolvable:$true] %s17_s13  ;;  %s28_s15 = int_to_ptr.vmem [resolvable:$true] %s27_s15 }
   0x4   :  { %s3099_s18 = scalar_lea.hbm %s3304_s0, 2048 }
   0x5   :  { %p3100_p0 = scmp.ne.s32.totalorder %s3304_s0, %s3099_s18  ;;  %p3103_p1 = scmp.lt.u32.totalorder %s3099_s18, %s3304_s0 }
   0x7   :  { %p3105_p2 = pnand %p3103_p1, %p3100_p0 }
   0x9   :  { %3108 = shalt.err (!%p3105_p2)
}
   0xa   :  { %s3109_s23 = scalar_lea.vmem %s18_s13, 2048  ;;  %p3114_p4 = scmp.lt.s32.totalorder %s18_s13, %s18_s13 }
   0xb   :  { %p3110_p3 = scmp.ne.s32.totalorder %s18_s13, %s3109_s23  ;;  %p3115_p5 = scmp.lt.s32.totalorder %s3109_s23, %s3109_s23 }
   0xd   :  { %p3116_p6 = por %p3115_p5, %p3114_p4 }
   0xf   :  { %p3117_p7 = pnand %p3116_p6, %p3110_p3 }
  0x11   :  { %3120 = shalt.err (!%p3117_p7)
}
  0x12   :  { %20 = dma.hbm_to_vmem [thread:$0]  %s3304_s0, 2048, %s18_s13, [#allocation3]  }
  0x13   :  { %s3121_s28 = scalar_lea.hbm %s3305_s1, 2048 }
  0x14   :  { %p3122_p8 = scmp.ne.s32.totalorder %s3305_s1, %s3121_s28  ;;  %p3125_p9 = scmp.lt.u32.totalorder %s3121_s28, %s3305_s1 }
  0x16   :  { %p3127_p10 = pnand %p3125_p9, %p3122_p8 }
  0x18   :  { %3130 = shalt.err (!%p3127_p10)
}
  0x19   :  { %s3131_s6 = scalar_lea.vmem %s28_s15, 2048  ;;  %p3136_p12 = scmp.lt.s32.totalorder %s28_s15, %s28_s15 }
  0x1a   :  { %p3132_p11 = scmp.ne.s32.totalorder %s28_s15, %s3131_s6  ;;  %p3137_p13 = scmp.lt.s32.totalorder %s3131_s6, %s3131_s6 }
  0x1c   :  { %p3138_p0 = por %p3137_p13, %p3136_p12 }
  0x1e   :  { %p3139_p1 = pnand %p3138_p0, %p3132_p11 }
  0x20   :  { %3142 = shalt.err (!%p3139_p1)
}
  0x21   :  { %30 = dma.hbm_to_vmem [thread:$0]  %s3305_s1, 2048, %s28_s15, [#allocation6]  }
  0x22   :  { %3165 = dma.done.wait [#allocation3], 2048  }
  0x23   :  { %3166 = vsyncadd [#allocation3], 4294965248 }
  0x24   :  { %3167 = dma.done.wait [#allocation6], 2048  }
  0x25   :  { %3168 = vsyncadd [#allocation6], 4294965248  ;;  %v103_v0 = vlaneseq  ;;  %v3173_v1 = vmov 1983009808   ;;  %v50_v6 = vld [vmem:[#allocation5] sm:$0xff]  ;;  %v51_v8 = vld [vmem:[#allocation5 + $0x8] sm:$0xff] }
  0x26   :  { %v101_v2 = vunpack.c.l.s4 %v3173_v1  ;;  %v67_v7 = vld [vmem:[#allocation2] sm:$0xff]  ;;  %v451_v10 = vcombine.high %v50_v6, %v50_v6  ;;  %v68_v13 = vld [vmem:[#allocation2 + $0x8] sm:$0xff]  ;;  %v52_v14 = vld [vmem:[#allocation5 + $0x10] sm:$0xff]  ;;  %v468_v16 = vcombine.high %v51_v8, %v51_v8  ;;  %vm43_vm0 = vcmask 9216   ;;  %s3175_s9 = smov [#allocation7]  }
  0x27   :  { %v104_v3 = vshrl.u32 %v103_v0, 7  ;;  %v99_v15 = vcombine.high %v67_v7, %v67_v7  ;;  %v69_v23 = vld [vmem:[#allocation2 + $0x10] sm:$0xff]  ;;  %v53_v24 = vld [vmem:[#allocation5 + $0x18] sm:$0xff]  ;;  %v116_v30 = vcombine.high %v68_v13, %v68_v13  ;;  %v485_v31 = vcombine.high %v52_v14, %v52_v14  ;;  %v54_v42 = vld [vmem:[#allocation5 + $0x20] sm:$0xff]  ;;  %s3049_s10 = sshll.u32 %s3175_s9, 4  ;;  %s3050_s10 = int_to_ptr.vmem [resolvable:$true] %s3049_s10 }
  0x28   :  { %v102_v4 = vunpack.c.0.s8 %v101_v2  ;;  %v133_v38 = vcombine.high %v69_v23, %v69_v23  ;;  %v70_v39 = vld [vmem:[#allocation2 + $0x18] sm:$0xff]  ;;  %v502_v41 = vcombine.high %v53_v24, %v53_v24  ;;  %v519_v51 = vcombine.high %v54_v42, %v54_v42  ;;  %v71_v52 = vld [vmem:[#allocation2 + $0x20] sm:$0xff]  ;;  %v55_v53 = vld [vmem:[#allocation5 + $0x28] sm:$0xff]  ;;  %s3143_s11 = scalar_lea.vmem %s3050_s10, 32  ;;  %p3148_p3 = scmp.lt.s32.totalorder %s3050_s10, %s3050_s10 }
  0x29   :  { %v150_v50 = vcombine.high %v70_v39, %v70_v39  ;;  %v167_v60 = vcombine.high %v71_v52, %v71_v52  ;;  %v536_v61 = vcombine.high %v55_v53, %v55_v53  ;;  %v72_v62 = vld [vmem:[#allocation2 + $0x28] sm:$0xff]  ;;  %v56_v1 = vld [vmem:[#allocation5 + $0x30] sm:$0xff]  ;;  %p3144_p2 = scmp.ne.s32.totalorder %s3050_s10, %s3143_s11  ;;  %p3149_p4 = scmp.lt.s32.totalorder %s3143_s11, %s3143_s11 }
  0x2a   :  { %v3220_v5 = vsub.s32 %v102_v4, %v104_v3 }
  0x2b   :  { %p3150_p5 = por %p3149_p4, %p3148_p3 }
  0x2c   :  { %v458_v9 = vrot.slane %v50_v6, %v3220_v5  ;;  %v106_v11 = vrot.slane %v67_v7, %v3220_v5  ;;  %v475_v12 = vrot.slane %v51_v8, %v3220_v5  ;;  %v123_v17 = vrot.slane %v68_v13, %v3220_v5 }
  0x2d   :  { %v492_v18 = vrot.slane %v52_v14, %v3220_v5  ;;  %v465_v20 = vrot.slane %v451_v10, %v3220_v5  ;;  %v113_v25 = vrot.slane %v99_v15, %v3220_v5  ;;  %v482_v26 = vrot.slane %v468_v16, %v3220_v5  ;;  %p3151_p6 = pnand %p3150_p5, %p3144_p2 }
  0x2e   :  { %v466_v19 = vcombine.high %v458_v9, %v458_v9  ;;  %v114_v21 = vcombine.high %v106_v11, %v106_v11  ;;  %v483_v22 = vcombine.high %v475_v12, %v475_v12  ;;  %v131_v27 = vcombine.high %v123_v17, %v123_v17 }
  0x2f   :  { %v500_v28 = vcombine.high %v492_v18, %v492_v18  ;;  %v467_v29 = vcombine.high %v465_v20, %v465_v20  ;;  %v115_v32 = vcombine.high %v113_v25, %v113_v25  ;;  %v484_v33 = vcombine.high %v482_v26, %v482_v26 }
  0x30   :  { %787 = vmatprep.subr.mxu0 %v466_v19  ;;  %851 = vmatprep.mubr.f32.mxu0 %v114_v21  ;;  %v140_v34 = vrot.slane %v69_v23, %v3220_v5  ;;  %v509_v35 = vrot.slane %v53_v24, %v3220_v5  ;;  %v130_v36 = vrot.slane %v116_v30, %v3220_v5  ;;  %v74_v21 = vld [vmem:[#allocation2 + $0x38] sm:$0xff]  ;;  %v58_v24 = vld [vmem:[#allocation5 + $0x40] sm:$0xff] }
  0x31   :  { %788 = vmatpush1.xpose.msra.mxu0 %v458_v9  ;;  %857 = vmatprep.subr.mxu1 %v467_v29  ;;  %v499_v37 = vrot.slane %v485_v31, %v3220_v5  ;;  %v147_v45 = vrot.slane %v133_v38, %v3220_v5  ;;  %v516_v47 = vrot.slane %v502_v41, %v3220_v5 }
  0x32   :  { %927 = vmatprep.subr.mxu0 %v483_v22  ;;  %858 = vmatpush1.xpose.msra.mxu1 %v465_v20  ;;  %v148_v40 = vcombine.high %v140_v34, %v140_v34  ;;  %v132_v43 = vcombine.high %v130_v36, %v130_v36  ;;  %v517_v46 = vcombine.high %v509_v35, %v509_v35 }
  0x33   :  { %921 = vmatprep.mubr.f32.mxu1 %v115_v32  ;;  %997 = vmatprep.subr.mxu1 %v484_v33  ;;  %v501_v44 = vcombine.high %v499_v37, %v499_v37  ;;  %v157_v48 = vrot.slane %v70_v39, %v3220_v5  ;;  %v526_v49 = vrot.slane %v54_v42, %v3220_v5  ;;  %v75_v33 = vld [vmem:[#allocation2 + $0x40] sm:$0xff] }
  0x34   :  { %852 = vmatmul.mubr.f32.vlgmr.msra.gmra.mrb[0].mxu0 %v106_v11  ;;  %v149_v54 = vcombine.high %v147_v45, %v147_v45  ;;  %v518_v55 = vcombine.high %v516_v47, %v516_v47  ;;  %v164_v57 = vrot.slane %v150_v50, %v3220_v5  ;;  %v533_v58 = vrot.slane %v519_v51, %v3220_v5  ;;  %v73_v11 = vld [vmem:[#allocation2 + $0x30] sm:$0xff] }
  0x35   :  { %928 = vmatpush1.xpose.msra.mxu0 %v475_v12  ;;  %991 = vmatprep.mubr.f32.mxu0 %v131_v27  ;;  %v165_v56 = vcombine.high %v157_v48, %v157_v48  ;;  %v174_v59 = vrot.slane %v71_v52, %v3220_v5  ;;  %v534_v63 = vcombine.high %v526_v49, %v526_v49  ;;  %v57_v12 = vld [vmem:[#allocation5 + $0x38] sm:$0xff] }
  0x36   :  { %922 = vmatmul.mubr.f32.vlgmr.msra.gmra.mrb[0].mxu1 %v113_v25  ;;  %1067 = vmatprep.subr.mxu0 %v500_v28  ;;  %v543_v0 = vrot.slane %v55_v53, %v3220_v5  ;;  %v166_v2 = vcombine.high %v164_v57, %v164_v57  ;;  %v181_v3 = vrot.slane %v167_v60, %v3220_v5  ;;  %v61_v60 = vld [vmem:[#allocation5 + $0x58] sm:$0xff] }
  0x37   :  { %998 = vmatpush1.xpose.msra.mxu1 %v482_v26  ;;  %1061 = vmatprep.mubr.f32.mxu1 %v132_v43  ;;  %v550_v4 = vrot.slane %v536_v61, %v3220_v5  ;;  %v535_v6 = vcombine.high %v533_v58, %v533_v58  ;;  %v184_v7 = vcombine.high %v72_v62, %v72_v62 }
  0x38   :  { %992 = vmatmul.mubr.f32.vlgmr.msra.gmra.mrb[2].mxu0 %v123_v17  ;;  %1137 = vmatprep.subr.mxu1 %v501_v44  ;;  %v182_v8 = vcombine.high %v174_v59, %v174_v59  ;;  %v191_v9 = vrot.slane %v72_v62, %v3220_v5  ;;  %v553_v10 = vcombine.high %v56_v1, %v56_v1 }
  0x39   :  { %1068 = vmatpush1.xpose.msra.mxu0 %v492_v18  ;;  %1131 = vmatprep.mubr.f32.mxu0 %v148_v40  ;;  %v551_v13 = vcombine.high %v543_v0, %v543_v0  ;;  %v560_v14 = vrot.slane %v56_v1, %v3220_v5  ;;  %v183_v15 = vcombine.high %v181_v3, %v181_v3 }
  0x3a   :  { %1062 = vmatmul.mubr.f32.vlgmr.msra.gmra.mrb[2].mxu1 %v130_v36  ;;  %1207 = vmatprep.subr.mxu0 %v517_v46  ;;  %v552_v16 = vcombine.high %v550_v4, %v550_v4  ;;  %v198_v17 = vrot.slane %v184_v7, %v3220_v5  ;;  %v567_v18 = vrot.slane %v553_v10, %v3220_v5  ;;  %v59_v36 = vld [vmem:[#allocation5 + $0x48] sm:$0xff] }
  0x3b   :  { %1138 = vmatpush1.xpose.msra.mxu1 %v499_v37  ;;  %1201 = vmatprep.mubr.f32.mxu1 %v149_v54  ;;  %v201_v19 = vcombine.high %v73_v11, %v73_v11  ;;  %v570_v20 = vcombine.high %v57_v12, %v57_v12  ;;  %v199_v22 = vcombine.high %v191_v9, %v191_v9 }
  0x3c   :  { %1132 = vmatmul.mubr.f32.vlgmr.msra.gmra.mrb[4].mxu0 %v140_v34  ;;  %1277 = vmatprep.subr.mxu1 %v518_v55  ;;  %v208_v23 = vrot.slane %v73_v11, %v3220_v5  ;;  %v568_v25 = vcombine.high %v560_v14, %v560_v14  ;;  %v577_v26 = vrot.slane %v57_v12, %v3220_v5 }
  0x3d   :  { %1208 = vmatpush1.xpose.msra.mxu0 %v509_v35  ;;  %1271 = vmatprep.mubr.f32.mxu0 %v165_v56  ;;  %v200_v27 = vcombine.high %v198_v17, %v198_v17  ;;  %v215_v28 = vrot.slane %v201_v19, %v3220_v5  ;;  %v218_v29 = vcombine.high %v74_v21, %v74_v21 }
  0x3e   :  { %1202 = vmatmul.mubr.f32.vlgmr.msra.gmra.mrb[4].mxu1 %v147_v45  ;;  %1347 = vmatprep.subr.mxu0 %v534_v63  ;;  %v569_v30 = vcombine.high %v567_v18, %v567_v18  ;;  %v584_v31 = vrot.slane %v570_v20, %v3220_v5  ;;  %v587_v32 = vcombine.high %v58_v24, %v58_v24  ;;  %v76_v45 = vld [vmem:[#allocation2 + $0x48] sm:$0xff] }
  0x3f   :  { %1278 = vmatpush1.xpose.msra.mxu1 %v516_v47  ;;  %1341 = vmatprep.mubr.f32.mxu1 %v166_v2  ;;  %v216_v34 = vcombine.high %v208_v23, %v208_v23  ;;  %v225_v35 = vrot.slane %v74_v21, %v3220_v5  ;;  %v585_v37 = vcombine.high %v577_v26, %v577_v26  ;;  %v63_v21 = vld [vmem:[#allocation5 + $0x68] sm:$0xff] }
  0x40   :  { %1272 = vmatmul.mubr.f32.vlgmr.msra.gmra.mrb[6].mxu0 %v157_v48  ;;  %1417 = vmatprep.subr.mxu1 %v535_v6  ;;  %v594_v38 = vrot.slane %v58_v24, %v3220_v5  ;;  %v217_v39 = vcombine.high %v215_v28, %v215_v28  ;;  %v232_v40 = vrot.slane %v218_v29, %v3220_v5  ;;  %v60_v48 = vld [vmem:[#allocation5 + $0x50] sm:$0xff]  ;;  %v78_v6 = vld [vmem:[#allocation2 + $0x58] sm:$0xff] }
  0x41   :  { %1348 = vmatpush1.xpose.msra.mxu0 %v526_v49  ;;  %1411 = vmatprep.mubr.f32.mxu0 %v182_v8  ;;  %v235_v41 = vcombine.high %v75_v33, %v75_v33  ;;  %v586_v42 = vcombine.high %v584_v31, %v584_v31  ;;  %v601_v43 = vrot.slane %v587_v32, %v3220_v5 }
  0x42   :  { %1342 = vmatmul.mubr.f32.vlgmr.msra.gmra.mrb[6].mxu1 %v164_v57  ;;  %1487 = vmatprep.subr.mxu0 %v551_v13  ;;  %v604_v44 = vcombine.high %v59_v36, %v59_v36  ;;  %v233_v46 = vcombine.high %v225_v35, %v225_v35  ;;  %v242_v47 = vrot.slane %v75_v33, %v3220_v5  ;;  %v77_v57 = vld [vmem:[#allocation2 + $0x50] sm:$0xff] }
  0x43   :  { %1418 = vmatpush1.xpose.msra.mxu1 %v533_v58  ;;  %1481 = vmatprep.mubr.f32.mxu1 %v183_v15  ;;  %v602_v49 = vcombine.high %v594_v38, %v594_v38  ;;  %v611_v50 = vrot.slane %v59_v36, %v3220_v5  ;;  %v234_v51 = vcombine.high %v232_v40, %v232_v40  ;;  %v64_v33 = vld [vmem:[#allocation5 + $0x70] sm:$0xff] }
  0x44   :  { %1412 = vmatmul.mubr.f32.vlgmr.msra.gmra.mrb[8].mxu0 %v174_v59  ;;  %1557 = vmatprep.subr.mxu1 %v552_v16  ;;  %v249_v52 = vrot.slane %v235_v41, %v3220_v5  ;;  %v252_v53 = vcombine.high %v76_v45, %v76_v45  ;;  %v603_v54 = vcombine.high %v601_v43, %v601_v43 }
  0x45   :  { %1488 = vmatpush1.xpose.msra.mxu0 %v543_v0  ;;  %1551 = vmatprep.mubr.f32.mxu0 %v199_v22  ;;  %v618_v55 = vrot.slane %v604_v44, %v3220_v5  ;;  %v621_v56 = vcombine.high %v60_v48, %v60_v48  ;;  %v250_v58 = vcombine.high %v242_v47, %v242_v47 }
  0x46   :  { %1482 = vmatmul.mubr.f32.vlgmr.msra.gmra.mrb[8].mxu1 %v181_v3  ;;  %1627 = vmatprep.subr.mxu0 %v568_v25  ;;  %v259_v59 = vrot.slane %v76_v45, %v3220_v5  ;;  %v619_v61 = vcombine.high %v611_v50, %v611_v50  ;;  %v628_v62 = vrot.slane %v60_v48, %v3220_v5  ;;  %v65_v45 = vld [vmem:[#allocation5 + $0x78] sm:$0xff] }
  0x47   :  { %1558 = vmatpush1.xpose.msra.mxu1 %v550_v4  ;;  %1621 = vmatprep.mubr.f32.mxu1 %v200_v27  ;;  %v251_v63 = vcombine.high %v249_v52, %v249_v52  ;;  %v266_v0 = vrot.slane %v252_v53, %v3220_v5  ;;  %v269_v1 = vcombine.high %v77_v57, %v77_v57 }
  0x48   :  { %1552 = vmatmul.mubr.f32.vlgmr.msra.gmra.mrb[10].mxu0 %v191_v9  ;;  %1697 = vmatprep.subr.mxu1 %v569_v30  ;;  %v620_v2 = vcombine.high %v618_v55, %v618_v55  ;;  %v635_v3 = vrot.slane %v621_v56, %v3220_v5  ;;  %v638_v4 = vcombine.high %v61_v60, %v61_v60  ;;  %v62_v9 = vld [vmem:[#allocation5 + $0x60] sm:$0xff]  ;;  %v80_v30 = vld [vmem:[#allocation2 + $0x68] sm:$0xff] }
  0x49   :  { %1628 = vmatpush1.xpose.msra.mxu0 %v560_v14  ;;  %1691 = vmatprep.mubr.f32.mxu0 %v216_v34  ;;  %v267_v7 = vcombine.high %v259_v59, %v259_v59  ;;  %v276_v8 = vrot.slane %v77_v57, %v3220_v5  ;;  %v636_v10 = vcombine.high %v628_v62, %v628_v62 }
  0x4a   :  { %1622 = vmatmul.mubr.f32.vlgmr.msra.gmra.mrb[10].mxu1 %v198_v17  ;;  %1767 = vmatprep.subr.mxu0 %v585_v37  ;;  %v645_v11 = vrot.slane %v61_v60, %v3220_v5  ;;  %v268_v12 = vcombine.high %v266_v0, %v266_v0  ;;  %v283_v13 = vrot.slane %v269_v1, %v3220_v5 }
  0x4b   :  { %1698 = vmatpush1.xpose.msra.mxu1 %v567_v18  ;;  %1761 = vmatprep.mubr.f32.mxu1 %v217_v39  ;;  %v286_v14 = vcombine.high %v78_v6, %v78_v6  ;;  %v637_v15 = vcombine.high %v635_v3, %v635_v3  ;;  %v652_v16 = vrot.slane %v638_v4, %v3220_v5  ;;  %v79_v18 = vld [vmem:[#allocation2 + $0x60] sm:$0xff] }
  0x4c   :  { %1692 = vmatmul.mubr.f32.vlgmr.msra.gmra.mrb[12].mxu0 %v208_v23  ;;  %1837 = vmatprep.subr.mxu1 %v586_v42  ;;  %v655_v17 = vcombine.high %v62_v9, %v62_v9  ;;  %v284_v19 = vcombine.high %v276_v8, %v276_v8  ;;  %v293_v20 = vrot.slane %v78_v6, %v3220_v5  ;;  %v81_v42 = vld [vmem:[#allocation2 + $0x70] sm:$0xff] }
  0x4d   :  { %1768 = vmatpush1.xpose.msra.mxu0 %v577_v26  ;;  %1831 = vmatprep.mubr.f32.mxu0 %v233_v46  ;;  %v653_v22 = vcombine.high %v645_v11, %v645_v11  ;;  %v662_v23 = vrot.slane %v62_v9, %v3220_v5  ;;  %v285_v24 = vcombine.high %v283_v13, %v283_v13 }
  0x4e   :  { %1762 = vmatmul.mubr.f32.vlgmr.msra.gmra.mrb[12].mxu1 %v215_v28  ;;  %1907 = vmatprep.subr.mxu0 %v602_v49  ;;  %v300_v25 = vrot.slane %v286_v14, %v3220_v5  ;;  %v303_v26 = vcombine.high %v79_v18, %v79_v18  ;;  %v654_v27 = vcombine.high %v652_v16, %v652_v16 }
  0x4f   :  { %1838 = vmatpush1.xpose.msra.mxu1 %v584_v31  ;;  %1901 = vmatprep.mubr.f32.mxu1 %v234_v51  ;;  %v669_v28 = vrot.slane %v655_v17, %v3220_v5  ;;  %v672_v29 = vcombine.high %v63_v21, %v63_v21  ;;  %v301_v31 = vcombine.high %v293_v20, %v293_v20 }
  0x50   :  { %1832 = vmatmul.mubr.f32.vlgmr.msra.gmra.mrb[14].mxu0 %v225_v35  ;;  %1977 = vmatprep.subr.mxu1 %v603_v54  ;;  %v310_v32 = vrot.slane %v79_v18, %v3220_v5  ;;  %v670_v34 = vcombine.high %v662_v23, %v662_v23  ;;  %v679_v35 = vrot.slane %v63_v21, %v3220_v5  ;;  %v82_v54 = vld [vmem:[#allocation2 + $0x78] sm:$0xff] }
  0x51   :  { %1908 = vmatpush1.xpose.msra.mxu0 %v594_v38  ;;  %1971 = vmatprep.mubr.f32.mxu0 %v250_v58  ;;  %v302_v36 = vcombine.high %v300_v25, %v300_v25  ;;  %v317_v37 = vrot.slane %v303_v26, %v3220_v5  ;;  %v320_v38 = vcombine.high %v80_v30, %v80_v30 }
  0x52   :  { %1902 = vmatmul.mubr.f32.vlgmr.msra.gmra.mrb[14].mxu1 %v232_v40  ;;  %2047 = vmatprep.subr.mxu0 %v619_v61  ;;  %v671_v39 = vcombine.high %v669_v28, %v669_v28  ;;  %v686_v40 = vrot.slane %v672_v29, %v3220_v5  ;;  %v689_v41 = vcombine.high %v64_v33, %v64_v33 }
  0x53   :  { %1978 = vmatpush1.xpose.msra.mxu1 %v601_v43  ;;  %2041 = vmatprep.mubr.f32.mxu1 %v251_v63  ;;  %v318_v43 = vcombine.high %v310_v32, %v310_v32  ;;  %v327_v44 = vrot.slane %v80_v30, %v3220_v5  ;;  %v687_v46 = vcombine.high %v679_v35, %v679_v35 }
  0x54   :  { %1972 = vmatmul.mubr.f32.vlgmr.msra.gmra.mrb[16].mxu0 %v242_v47  ;;  %2117 = vmatprep.subr.mxu1 %v620_v2  ;;  %v696_v47 = vrot.slane %v64_v33, %v3220_v5  ;;  %v319_v48 = vcombine.high %v317_v37, %v317_v37  ;;  %v334_v49 = vrot.slane %v320_v38, %v3220_v5 }
  0x55   :  { %2048 = vmatpush1.xpose.msra.mxu0 %v611_v50  ;;  %2111 = vmatprep.mubr.f32.mxu0 %v267_v7  ;;  %v337_v50 = vcombine.high %v81_v42, %v81_v42  ;;  %v688_v51 = vcombine.high %v686_v40, %v686_v40  ;;  %v706_v53 = vcombine.high %v65_v45, %v65_v45 }
  0x56   :  { %2042 = vmatmul.mubr.f32.vlgmr.msra.gmra.mrb[16].mxu1 %v249_v52  ;;  %2187 = vmatprep.subr.mxu0 %v636_v10  ;;  %v703_v52 = vrot.slane %v689_v41, %v3220_v5  ;;  %v344_v56 = vrot.slane %v81_v42, %v3220_v5  ;;  %v704_v57 = vcombine.high %v696_v47, %v696_v47 }
  0x57   :  { %2118 = vmatpush1.xpose.msra.mxu1 %v618_v55  ;;  %2181 = vmatprep.mubr.f32.mxu1 %v268_v12  ;;  %v335_v55 = vcombine.high %v327_v44, %v327_v44  ;;  %v713_v58 = vrot.slane %v65_v45, %v3220_v5  ;;  %v351_v60 = vrot.slane %v337_v50, %v3220_v5 }
  0x58   :  { %2112 = vmatmul.mubr.f32.vlgmr.msra.gmra.mrb[18].mxu0 %v259_v59  ;;  %2257 = vmatprep.subr.mxu1 %v637_v15  ;;  %v336_v59 = vcombine.high %v334_v49, %v334_v49  ;;  %v354_v61 = vcombine.high %v82_v54, %v82_v54  ;;  %v720_v63 = vrot.slane %v706_v53, %v3220_v5 }
  0x59   :  { %2188 = vmatpush1.xpose.msra.mxu0 %v628_v62  ;;  %2251 = vmatprep.mubr.f32.mxu0 %v284_v19  ;;  %v705_v62 = vcombine.high %v703_v52, %v703_v52  ;;  %v361_v1 = vrot.slane %v82_v54, %v3220_v5  ;;  %v721_v2 = vcombine.high %v713_v58, %v713_v58 }
  0x5a   :  { %2182 = vmatmul.mubr.f32.vlgmr.msra.gmra.mrb[18].mxu1 %v266_v0  ;;  %2327 = vmatprep.subr.mxu0 %v653_v22  ;;  %v352_v0 = vcombine.high %v344_v56, %v344_v56  ;;  %v368_v4 = vrot.slane %v354_v61, %v3220_v5  ;;  %v722_v6 = vcombine.high %v720_v63, %v720_v63  ;;  %v3174_v5 = vmov 0.0  }
  0x5b   :  { %2258 = vmatpush1.xpose.msra.mxu1 %v635_v3  ;;  %2321 = vmatprep.mubr.f32.mxu1 %v285_v24  ;;  %v353_v3 = vcombine.high %v351_v60, %v351_v60  ;;  %v369_v7 = vcombine.high %v361_v1, %v361_v1  ;;  %44 = vst.msk [vmem:[#allocation7] sm:$0x3] %vm43_vm0, %v3174_v5 }
  0x5c   :  { %2252 = vmatmul.mubr.f32.vlgmr.msra.gmra.mrb[20].mxu0 %v276_v8  ;;  %2397 = vmatprep.subr.mxu1 %v654_v27  ;;  %v370_v8 = vcombine.high %v368_v4, %v368_v4 }
  0x5d   :  { %2328 = vmatpush1.xpose.msra.mxu0 %v645_v11  ;;  %2391 = vmatprep.mubr.f32.mxu0 %v301_v31 }
  0x5e   :  { %2322 = vmatmul.mubr.f32.vlgmr.msra.gmra.mrb[20].mxu1 %v283_v13  ;;  %2467 = vmatprep.subr.mxu0 %v670_v34 }
  0x5f   :  { %2398 = vmatpush1.xpose.msra.mxu1 %v652_v16  ;;  %2461 = vmatprep.mubr.f32.mxu1 %v302_v36 }
  0x60   :  { %2392 = vmatmul.mubr.f32.vlgmr.msra.gmra.mrb[22].mxu0 %v293_v20  ;;  %2537 = vmatprep.subr.mxu1 %v671_v39 }
  0x61   :  { %2468 = vmatpush1.xpose.msra.mxu0 %v662_v23  ;;  %2531 = vmatprep.mubr.f32.mxu0 %v318_v43 }
  0x62   :  { %2462 = vmatmul.mubr.f32.vlgmr.msra.gmra.mrb[22].mxu1 %v300_v25  ;;  %2607 = vmatprep.subr.mxu0 %v687_v46 }
  0x63   :  { %2538 = vmatpush1.xpose.msra.mxu1 %v669_v28  ;;  %2601 = vmatprep.mubr.f32.mxu1 %v319_v48 }
  0x64   :  { %2532 = vmatmul.mubr.f32.vlgmr.msra.gmra.mrb[24].mxu0 %v310_v32  ;;  %2677 = vmatprep.subr.mxu1 %v688_v51 }
  0x65   :  { %2608 = vmatpush1.xpose.msra.mxu0 %v679_v35  ;;  %2671 = vmatprep.mubr.f32.mxu0 %v335_v55 }
  0x66   :  { %2602 = vmatmul.mubr.f32.vlgmr.msra.gmra.mrb[24].mxu1 %v317_v37  ;;  %2747 = vmatprep.subr.mxu0 %v704_v57 }
  0x67   :  { %2678 = vmatpush1.xpose.msra.mxu1 %v686_v40  ;;  %2741 = vmatprep.mubr.f32.mxu1 %v336_v59 }
  0x68   :  { %2672 = vmatmul.mubr.f32.vlgmr.msra.gmra.mrb[26].mxu0 %v327_v44  ;;  %2817 = vmatprep.subr.mxu1 %v705_v62 }
  0x69   :  { %2748 = vmatpush1.xpose.msra.mxu0 %v696_v47  ;;  %2811 = vmatprep.mubr.f32.mxu0 %v352_v0 }
  0x6a   :  { %2742 = vmatmul.mubr.f32.vlgmr.msra.gmra.mrb[26].mxu1 %v334_v49  ;;  %2887 = vmatprep.subr.mxu0 %v721_v2 }
  0x6b   :  { %2818 = vmatpush1.xpose.msra.mxu1 %v703_v52  ;;  %2881 = vmatprep.mubr.f32.mxu1 %v353_v3 }
  0x6c   :  { %2812 = vmatmul.mubr.f32.vlgmr.msra.gmra.mrb[28].mxu0 %v344_v56  ;;  %2957 = vmatprep.subr.mxu1 %v722_v6 }
  0x6d   :  { %2888 = vmatpush1.xpose.msra.mxu0 %v713_v58  ;;  %2951 = vmatprep.mubr.f32.mxu0 %v369_v7 }
  0x6e   :  { %2882 = vmatmul.mubr.f32.vlgmr.msra.gmra.mrb[28].mxu1 %v351_v60 }
  0x6f   :  { %2958 = vmatpush1.xpose.msra.mxu1 %v720_v63  ;;  %3021 = vmatprep.mubr.f32.mxu1 %v370_v8 }
  0x70   :  { %2952 = vmatmul.mubr.f32.vlgmr.msra.gmra.mrb[30].mxu0 %v361_v1 }
  0x72   :  { %3022 = vmatmul.mubr.f32.vlgmr.msra.gmra.mrb[30].mxu1 %v368_v4 }
 0x107   :  { %v853_v9 = vpop.f32.mrb[0].mxu0 }
 0x108   :  { %v855_v10 = vpop.f32.mrb[1].mxu0 }
 0x109   :  { %v923_v11 = vpop.f32.mrb[0].mxu1 }
 0x10a   :  { %v924_v12 = vadd.f32 %v923_v11, %v853_v9  ;;  %v925_v13 = vpop.f32.mrb[1].mxu1 }
 0x10b   :  { %v993_v14 = vpop.f32.mrb[2].mxu0 }
 0x10c   :  { %v994_v15 = vadd.f32 %v993_v14, %v924_v12  ;;  %v995_v16 = vpop.f32.mrb[3].mxu0 }
 0x10d   :  { %v1063_v17 = vpop.f32.mrb[2].mxu1 }
 0x10e   :  { %v1064_v18 = vadd.f32 %v1063_v17, %v994_v15  ;;  %v1065_v19 = vpop.f32.mrb[3].mxu1 }
 0x10f   :  { %v1133_v20 = vpop.f32.mrb[4].mxu0 }
 0x110   :  { %v1134_v21 = vadd.f32 %v1133_v20, %v1064_v18  ;;  %v1135_v22 = vpop.f32.mrb[5].mxu0 }
 0x111   :  { %v1203_v23 = vpop.f32.mrb[4].mxu1 }
 0x112   :  { %v1204_v24 = vadd.f32 %v1203_v23, %v1134_v21  ;;  %v1205_v25 = vpop.f32.mrb[5].mxu1 }
 0x113   :  { %v1273_v26 = vpop.f32.mrb[6].mxu0 }
 0x114   :  { %v1274_v27 = vadd.f32 %v1273_v26, %v1204_v24  ;;  %v1275_v28 = vpop.f32.mrb[7].mxu0 }
 0x115   :  { %v1343_v29 = vpop.f32.mrb[6].mxu1 }
 0x116   :  { %v1344_v30 = vadd.f32 %v1343_v29, %v1274_v27  ;;  %v1345_v31 = vpop.f32.mrb[7].mxu1 }
 0x117   :  { %v1413_v32 = vpop.f32.mrb[8].mxu0 }
 0x118   :  { %v1414_v33 = vadd.f32 %v1413_v32, %v1344_v30  ;;  %v1415_v34 = vpop.f32.mrb[9].mxu0 }
 0x119   :  { %v1483_v35 = vpop.f32.mrb[8].mxu1 }
 0x11a   :  { %v1484_v36 = vadd.f32 %v1483_v35, %v1414_v33  ;;  %v1485_v37 = vpop.f32.mrb[9].mxu1 }
 0x11b   :  { %v1553_v38 = vpop.f32.mrb[10].mxu0  ;;  %v66_v37 = vld [vmem:[#allocation7] sm:$0x3] }
 0x11c   :  { %v1554_v39 = vadd.f32 %v1553_v38, %v1484_v36  ;;  %v1555_v40 = vpop.f32.mrb[11].mxu0 }
 0x11d   :  { %v1623_v41 = vpop.f32.mrb[10].mxu1 }
 0x11e   :  { %v1624_v42 = vadd.f32 %v1623_v41, %v1554_v39  ;;  %v1625_v43 = vpop.f32.mrb[11].mxu1 }
 0x11f   :  { %v1693_v44 = vpop.f32.mrb[12].mxu0 }
 0x120   :  { %v1694_v45 = vadd.f32 %v1693_v44, %v1624_v42  ;;  %v1695_v46 = vpop.f32.mrb[13].mxu0  ;;  %v3061_v42 = vld [vmem:[%s3306_s2] ss:$0 sm:$0xff] }
 0x121   :  { %v1763_v47 = vpop.f32.mrb[12].mxu1 }
 0x122   :  { %v1764_v48 = vadd.f32 %v1763_v47, %v1694_v45  ;;  %v1765_v49 = vpop.f32.mrb[13].mxu1 }
 0x123   :  { %v1833_v50 = vpop.f32.mrb[14].mxu0 }
 0x124   :  { %v1834_v51 = vadd.f32 %v1833_v50, %v1764_v48  ;;  %v1835_v52 = vpop.f32.mrb[15].mxu0 }
 0x125   :  { %v1903_v53 = vpop.f32.mrb[14].mxu1 }
 0x126   :  { %v1904_v54 = vadd.f32 %v1903_v53, %v1834_v51  ;;  %v1905_v55 = vpop.f32.mrb[15].mxu1 }
 0x127   :  { %v1973_v56 = vpop.f32.mrb[16].mxu0 }
 0x128   :  { %v1974_v57 = vadd.f32 %v1973_v56, %v1904_v54  ;;  %v1975_v58 = vpop.f32.mrb[17].mxu0 }
 0x129   :  { %v2043_v59 = vpop.f32.mrb[16].mxu1 }
 0x12a   :  { %v2044_v60 = vadd.f32 %v2043_v59, %v1974_v57  ;;  %v2045_v61 = vpop.f32.mrb[17].mxu1 }
 0x12b   :  { %v2113_v62 = vpop.f32.mrb[18].mxu0 }
 0x12c   :  { %v2114_v63 = vadd.f32 %v2113_v62, %v2044_v60  ;;  %v2115_v0 = vpop.f32.mrb[19].mxu0 }
 0x12d   :  { %v2183_v1 = vpop.f32.mrb[18].mxu1 }
 0x12e   :  { %v2184_v2 = vadd.f32 %v2183_v1, %v2114_v63  ;;  %v2185_v3 = vpop.f32.mrb[19].mxu1 }
 0x12f   :  { %v2253_v4 = vpop.f32.mrb[20].mxu0 }
 0x130   :  { %v2254_v6 = vadd.f32 %v2253_v4, %v2184_v2  ;;  %v2255_v7 = vpop.f32.mrb[21].mxu0 }
 0x131   :  { %v2323_v8 = vpop.f32.mrb[20].mxu1 }
 0x132   :  { %v2324_v5 = vadd.f32 %v2323_v8, %v2254_v6  ;;  %v2325_v9 = vpop.f32.mrb[21].mxu1 }
 0x133   :  { %v2393_v10 = vpop.f32.mrb[22].mxu0 }
 0x134   :  { %v2394_v11 = vadd.f32 %v2393_v10, %v2324_v5  ;;  %v2395_v12 = vpop.f32.mrb[23].mxu0 }
 0x135   :  { %v2463_v13 = vpop.f32.mrb[22].mxu1 }
 0x136   :  { %v2464_v14 = vadd.f32 %v2463_v13, %v2394_v11  ;;  %v2465_v15 = vpop.f32.mrb[23].mxu1 }
 0x137   :  { %v2533_v16 = vpop.f32.mrb[24].mxu0 }
 0x138   :  { %v2534_v17 = vadd.f32 %v2533_v16, %v2464_v14  ;;  %v2535_v18 = vpop.f32.mrb[25].mxu0 }
 0x139   :  { %v2603_v19 = vpop.f32.mrb[24].mxu1 }
 0x13a   :  { %v2604_v20 = vadd.f32 %v2603_v19, %v2534_v17  ;;  %v2605_v21 = vpop.f32.mrb[25].mxu1 }
 0x13b   :  { %v2673_v22 = vpop.f32.mrb[26].mxu0 }
 0x13c   :  { %v2674_v23 = vadd.f32 %v2673_v22, %v2604_v20  ;;  %v2675_v24 = vpop.f32.mrb[27].mxu0 }
 0x13d   :  { %v2743_v25 = vpop.f32.mrb[26].mxu1 }
 0x13e   :  { %v2744_v26 = vadd.f32 %v2743_v25, %v2674_v23  ;;  %v2745_v27 = vpop.f32.mrb[27].mxu1 }
 0x13f   :  { %v2813_v28 = vpop.f32.mrb[28].mxu0 }
 0x140   :  { %v2814_v29 = vadd.f32 %v2813_v28, %v2744_v26  ;;  %v2815_v30 = vpop.f32.mrb[29].mxu0 }
 0x141   :  { %v2883_v31 = vpop.f32.mrb[28].mxu1 }
 0x142   :  { %v2884_v32 = vadd.f32 %v2883_v31, %v2814_v29  ;;  %v2885_v33 = vpop.f32.mrb[29].mxu1 }
 0x143   :  { %v2953_v34 = vpop.f32.mrb[30].mxu0 }
 0x144   :  { %v2954_v35 = vadd.f32 %v2953_v34, %v2884_v32  ;;  %v2955_v36 = vpop.f32.mrb[31].mxu0 }
 0x145   :  { %v3023_v38 = vpop.f32.mrb[30].mxu1 }
 0x146   :  { %v3024_v39 = vadd.f32 %v3023_v38, %v2954_v35  ;;  %v3025_v40 = vpop.f32.mrb[31].mxu1 }
 0x148   :  { %v3027_v41 = vadd.f32 %v3024_v39, %v66_v37 }
 0x14a   :  { %3029 = vst.msk [vmem:[#allocation7] sm:$0x3] %vm43_vm0, %v3027_v41 }
 0x151   :  { %v3033_v43 = vld [vmem:[#allocation7] sm:$0x3] }
 0x152   :  { %v3041_v44 = vadd.f32 %v3061_v42, %v3033_v43 }
 0x154   :  { %3042 = vst.msk [vmem:[#allocation7] sm:$0x3] %vm43_vm0, %v3041_v44 }
 0x155   :  { %3154 = shalt.err (!%p3151_p6)
}
 0x156   :  { %s3155_s14 = scalar_lea.hbm %s3307_s3, 32 }
 0x157   :  { %p3156_p7 = scmp.ne.s32.totalorder %s3307_s3, %s3155_s14  ;;  %p3159_p8 = scmp.lt.u32.totalorder %s3155_s14, %s3307_s3 }
 0x159   :  { %p3161_p9 = pnand %p3159_p8, %p3156_p7 }
 0x15b   :  { %3164 = shalt.err (!%p3161_p9)
}
 0x15c   :  { %3052 = dma.vmem_to_hbm [thread:$0]  %s3050_s10, 32, %s3307_s3, [#allocation4]  }
 0x15d   :  { %3169 = dma.done.wait [#allocation4], 32  }
 0x15e   :  { %3170 = vsyncadd [#allocation4], 4294967264 }
 0x15f   :  { %3056 = vsyncpa [#allocation3], 1 }
 0x160   :  { %3057 = vsyncpa [#allocation6], 1 }
 0x161   :  { %3058 = vsyncpa [#allocation4], 1 }

</bundles_post_ra>
